<compile_context>
chip_gen: v6e
topology: v6e:2x2x1
jax: 0.10.0
libtpu: 0.0.40
codegen_flags: <defaults>
</compile_context>

<pallas_src>
import math
import functools

import jax
import jax.numpy as jnp
from jax.experimental import pallas as pl
from jax.experimental.pallas import tpu as pltpu


def build_positional_encoding(d_model: int, max_len: int = 5000) -> jnp.ndarray:
    """One-time buffer setup (mirrors the PyTorch __init__): pe[max_len, 1, d_model]."""
    position = jnp.arange(max_len, dtype=jnp.float32)[:, None]
    div_term = jnp.exp(
        jnp.arange(0, d_model, 2, dtype=jnp.float32) * (-math.log(10000.0) / d_model)
    )
    pe = jnp.zeros((max_len, 1, d_model), dtype=jnp.float32)
    pe = pe.at[:, 0, 0::2].set(jnp.sin(position * div_term))
    pe = pe.at[:, 0, 1::2].set(jnp.cos(position * div_term))
    return pe


# ---------------------------------------------------------------------------
# Kernels
# ---------------------------------------------------------------------------

def _pe_plus_x(x_ref, pe_ref, batch):
    """x tile + pe tile, broadcasting pe over the batch axis (f32 accumulate)."""
    x = x_ref[...].astype(jnp.float32)
    pe = pe_ref[...].astype(jnp.float32)          # (ts, D)
    if x.ndim == 3:                               # fallback layout: (ts, B, D)
        return x + pe[:, None, :]
    if batch == 1:                                # dense layout, no broadcast needed
        return x + pe
    # dense layout (ts, B*D) with D % 128 == 0: static lane-aligned concat.
    return x + jnp.concatenate([pe] * batch, axis=-1)


def _apply_dropout(y, bits_u32, *, threshold, scale):
    # Integer threshold compare on raw PRNG bits: P(drop) = threshold / 2**32 == p.
    keep = bits_u32 >= jnp.uint32(threshold)
    return jnp.where(keep, y * jnp.float32(scale), jnp.float32(0.0))


def _pe_eval_kernel(x_ref, pe_ref, o_ref, *, batch):
    o_ref[...] = _pe_plus_x(x_ref, pe_ref, batch).astype(o_ref.dtype)


def _pe_train_device_prng_kernel(seed_ref, x_ref, pe_ref, o_ref, *, batch, threshold, scale):
    y = _pe_plus_x(x_ref, pe_ref, batch)
    # Fold the user seed with the tile index so each grid step gets its own stream.
    pltpu.prng_seed(seed_ref[0], pl.program_id(0))
    bits = pltpu.prng_random_bits(y.shape)
    if bits.dtype != jnp.uint32:
        bits = pltpu.bitcast(bits, jnp.uint32)
    o_ref[...] = _apply_dropout(y, bits, threshold=threshold, scale=scale).astype(o_ref.dtype)


def _pe_train_host_bits_kernel(x_ref, pe_ref, bits_ref, o_ref, *, batch, threshold, scale):
    y = _pe_plus_x(x_ref, pe_ref, batch)
    o_ref[...] = _apply_dropout(y, bits_ref[...], threshold=threshold, scale=scale).astype(o_ref.dtype)


# ---------------------------------------------------------------------------
# Wrapper
# ---------------------------------------------------------------------------

def _tpu_vmem_capacity_bytes() -> int:
    try:
        return int(pltpu.get_tpu_info().vmem_capacity_bytes)
    except Exception:
        return 64 * 1024 * 1024          # conservative (v7x-sized) fallback


def _padded_block_bytes(block_shape, itemsize):
    """VMEM footprint of one block, including sublane/lane layout padding."""
    rows_per_group = max(1, 32 // itemsize)      # f32: 8 rows/vreg, bf16: 16, ...
    dims = list(block_shape)
    lane = pl.cdiv(dims[-1], 128) * 128
    sub = pl.cdiv(dims[-2], rows_per_group) * rows_per_group if len(dims) >= 2 else 1
    lead = 1
    for d in dims[:-2]:
        lead *= int(d)
    return lead * sub * lane * itemsize


def positional_encoding_forward(
    x,
    pe_full,
    *,
    p: float = 0.1,
    training: bool = True,
    seed: int = 0,
    seq_tile=None,
):
    """x: [S, B, D]; pe_full: [max_len, 1, D] or [max_len, D].  Returns dropout(x + pe[:S])."""
    S, B, D = x.shape
    pe2 = pe_full[:, 0, :] if pe_full.ndim == 3 else pe_full   # squeeze the size-1 sublane dim
    assert pe2.shape[0] >= S and pe2.shape[1] == D
    assert 0.0 <= float(p) < 1.0, "dropout p must be in [0, 1)"

    itemsize = x.dtype.itemsize
    BD = B * D
    # Lane/sublane-dense 2-D layout when the batch blocks are lane aligned.
    dense_2d = (B == 1) or (D % 128 == 0)

    apply_dropout = bool(training) and float(p) > 0.0
    # In-kernel hardware PRNG only lowers through Mosaic on a real TPU; fall
    # back to host-generated bits on other backends (CPU / interpret checks).
    use_device_prng = apply_dropout and jax.default_backend() == "tpu"
    threshold = min(int(round(float(p) * float(2 ** 32))), 2 ** 32 - 1)
    scale = 1.0 / (1.0 - float(p)) if apply_dropout else 1.0

    # --- generation-aware tile size / VMEM budget -----------------------------
    vmem_cap = _tpu_vmem_capacity_bytes()
    small_vmem = vmem_cap <= 64 * 1024 * 1024                   # v7x-class chip
    target_tile_bytes = (8 if small_vmem else 4) * 1024 * 1024  # amortize ~0.35us/step
    vmem_ceiling = (vmem_cap - 16 * 1024 * 1024) if small_vmem \
        else min(vmem_cap, 100 * 1024 * 1024)

    if dense_2d:
        x_block = lambda ts: (ts, BD)
        x_map = lambda i: (i, 0)
        x_op = x.reshape(S, BD)                                  # free reshape
        per_row_bytes = pl.cdiv(BD, 128) * 128 * itemsize
    else:
        x_block = lambda ts: (ts, B, D)
        x_map = lambda i: (i, 0, 0)
        x_op = x
        rg = max(1, 32 // itemsize)
        per_row_bytes = (pl.cdiv(B, rg) * rg) * (pl.cdiv(D, 128) * 128) * itemsize

    def tile_bytes(ts):
        xb = _padded_block_bytes(x_block(ts), itemsize)
        pb = _padded_block_bytes((ts, D), pe2.dtype.itemsize)
        bb = _padded_block_bytes(x_block(ts), 4) if (apply_dropout and not use_device_prng) else 0
        return 2 * (2 * xb + pb + bb)          # 2x-buffered x-in, x-out, pe(, bits)

    if seq_tile is not None:
        ts = int(seq_tile)
    else:
        ts = max(1, target_tile_bytes // max(per_row_bytes, 1))
    ts = max(1, min(ts, S))
    if seq_tile is None and S > 8:
        # Keep tiles 8-row aligned and guarantee >= 2 grid steps so double
        # buffering / v7x megacore sharding always have work to overlap.
        ts = min(ts, max(8, ((S // 2) // 8) * 8))
        ts = max(8, (ts // 8) * 8)
        ts = min(ts, S)
    # Safety: shrink until the (padding-aware) double-buffered footprint fits.
    while ts > 1 and tile_bytes(ts) > vmem_ceiling:
        ts = max(1, ts // 2)
    grid = (pl.cdiv(S, ts),)

    x_spec = pl.BlockSpec(x_block(ts), x_map)
    out_spec = pl.BlockSpec(x_block(ts), x_map)
    pe_spec = pl.BlockSpec((ts, D), lambda i: (i, 0))   # index pe directly, no [:S] copy
    # TODO(synk): sweep pipeline_mode=pl.Buffered(3) on x/out specs on v7x if
    #             profiling shows exposed DMA-issue latency after the tile bump.

    if not apply_dropout:
        kernel = functools.partial(_pe_eval_kernel, batch=B)
        in_specs = [x_spec, pe_spec]
        operands = (x_op, pe2)
        extra_io = 0
    elif use_device_prng:
        kernel = functools.partial(_pe_train_device_prng_kernel,
                                   batch=B, threshold=threshold, scale=scale)
        in_specs = [pl.BlockSpec(memory_space=pltpu.MemorySpace.SMEM), x_spec, pe_spec]
        operands = (jnp.asarray([seed], dtype=jnp.int32), x_op, pe2)
        extra_io = 0
    else:
        kernel = functools.partial(_pe_train_host_bits_kernel,
                                   batch=B, threshold=threshold, scale=scale)
        bits = jax.random.bits(jax.random.PRNGKey(int(seed)), x_op.shape, dtype=jnp.uint32)
        in_specs = [x_spec, pe_spec, pl.BlockSpec(x_block(ts), x_map)]
        operands = (x_op, pe2, bits)
        extra_io = int(bits.size) * 4

    vmem_needed = tile_bytes(ts)
    vmem_limit = int(max(16 * 1024 * 1024,
                         min(vmem_ceiling, vmem_needed + 4 * 1024 * 1024)))

    io_bytes = 2 * S * BD * itemsize + S * D * pe2.dtype.itemsize + extra_io
    cost = pl.CostEstimate(flops=2 * S * BD, transcendentals=0,
                           bytes_accessed=int(io_bytes))

    out = pl.pallas_call(
        kernel,
        out_shape=jax.ShapeDtypeStruct(x_op.shape, x.dtype),
        grid=grid,
        in_specs=in_specs,
        out_specs=out_spec,
        compiler_params=pltpu.CompilerParams(
            dimension_semantics=("parallel",),    # no accumulator -> megacore shardable
            vmem_limit_bytes=vmem_limit,
        ),
        cost_estimate=cost,
    )(*operands)
    return out.reshape(S, B, D)


# ---------------------------------------------------------------------------
# Demo / checks
# ---------------------------------------------------------------------------

if __name__ == "__main__":
    p = 0.1

    # 1) Small module-like shapes (seq=8, batch=2, d_model=32): eval mode is an
    #    exact x + pe[:S]; exercises the [S, B, D] fallback layout (D < 128).
    S, B, D = 8, 2, 32
    max_len = 64
    x = jax.random.normal(jax.random.PRNGKey(0), (S, B, D), dtype=jnp.float32)
    pe_full = build_positional_encoding(D, max_len)
    ref = x + pe_full[:S]

    y_eval = jax.block_until_ready(
        positional_encoding_forward(x, pe_full, p=p, training=False)
    )
    assert y_eval.shape == (S, B, D)
    assert jnp.allclose(y_eval, ref, atol=1e-6), "eval-mode mismatch"

    # 2) Lane-aligned d_model with a multi-tile grid and a ragged tail
    #    (exercises the dense [S, B*D] layout, cdiv grid and masked last block).
    S2, B2, D2 = 37, 4, 128
    x2 = jax.random.normal(jax.random.PRNGKey(1), (S2, B2, D2), dtype=jnp.float32)
    pe2_full = build_positional_encoding(D2, 64)
    y2 = jax.block_until_ready(
        positional_encoding_forward(x2, pe2_full, p=p, training=False, seq_tile=8)
    )
    assert jnp.allclose(y2, x2 + pe2_full[:S2], atol=1e-6), "tiled eval-mode mismatch"

    # 3) Training mode: every output element is either dropped (0) or (x+pe)/(1-p).
    y_train = jax.block_until_ready(
        positional_encoding_forward(x, pe_full, p=p, training=True, seed=0)
    )
    assert y_train.shape == (S, B, D)
    scaled = ref / (1.0 - p)
    dropped = jnp.isclose(y_train, 0.0, atol=1e-6)
    kept = jnp.isclose(y_train, scaled, rtol=1e-5, atol=1e-5)
    assert bool(jnp.all(dropped | kept)), "training-mode values are not {0, (x+pe)/(1-p)}"

    print("KERNEL_OK")
</pallas_src>

<mosaic_0001>
module attributes {stable_mosaic.version = 11 : i64} {
  func.func @_pe_eval_kernel(%arg0: i32, %arg1: memref<8x2x32xf32, #tpu.memory_space<vmem>>, %arg2: memref<8x32xf32, #tpu.memory_space<vmem>>, %arg3: memref<8x2x32xf32, #tpu.memory_space<vmem>>) attributes {dimension_semantics = [#tpu.dimension_semantics<parallel>], iteration_bounds = array<i64: 1>, scalar_prefetch = 0 : i64, scratch_operands = 0 : i64, tpu.core_type = #tpu.core_type<tc>, window_params = [{transform_indices = @transform_0, window_bounds = array<i64: 8, 2, 32>}, {transform_indices = @transform_1, window_bounds = array<i64: 8, 32>}, {transform_indices = @transform_2, window_bounds = array<i64: 8, 2, 32>}]} {
    %c0 = arith.constant 0 : index
    %c0_0 = arith.constant 0 : index
    %c0_1 = arith.constant 0 : index
    %0 = vector.load %arg1[%c0, %c0_0, %c0_1] : memref<8x2x32xf32, #tpu.memory_space<vmem>>, vector<8x2x32xf32>
    %c0_2 = arith.constant 0 : index
    %c0_3 = arith.constant 0 : index
    %1 = vector.load %arg2[%c0_2, %c0_3] : memref<8x32xf32, #tpu.memory_space<vmem>>, vector<8x32xf32>
    %2 = vector.shape_cast %1 : vector<8x32xf32> to vector<8x1x32xf32>
    %3 = vector.broadcast %2 : vector<8x1x32xf32> to vector<8x2x32xf32>
    %4 = arith.addf %0, %3 : vector<8x2x32xf32>
    %c0_4 = arith.constant 0 : index
    %c0_5 = arith.constant 0 : index
    %c0_6 = arith.constant 0 : index
    %5 = vector.load %arg3[%c0_4, %c0_5, %c0_6] : memref<8x2x32xf32, #tpu.memory_space<vmem>>, vector<8x2x32xf32>
    tpu.vector_store %arg3[%c0_4, %c0_5, %c0_6], %4 {strides = array<i32>} : memref<8x2x32xf32, #tpu.memory_space<vmem>>, vector<8x2x32xf32>,
    return
  }
  func.func @transform_0(%arg0: i32) -> (i32, i32, i32) {
    %c0_i32 = arith.constant 0 : i32
    %c0_i32_0 = arith.constant 0 : i32
    %c0_i32_1 = arith.constant 0 : i32
    return %arg0, %c0_i32, %c0_i32_0 : i32, i32, i32
  }
  func.func @transform_1(%arg0: i32) -> (i32, i32) {
    %c0_i32 = arith.constant 0 : i32
    %c0_i32_0 = arith.constant 0 : i32
    return %arg0, %c0_i32 : i32, i32
  }
  func.func @transform_2(%arg0: i32) -> (i32, i32, i32) {
    %c0_i32 = arith.constant 0 : i32
    %c0_i32_0 = arith.constant 0 : i32
    %c0_i32_1 = arith.constant 0 : i32
    return %arg0, %c0_i32, %c0_i32_0 : i32, i32, i32
  }
}

</mosaic_0001>

<bundles_post_ra>
// kernel: tpu_custom_call.1
= control target key start
LH: loop header
LB: loop body
LE: loop exit
PB: predicated region body
PF: predicated region fallthrough
CT: control target
= control target key end

     0   :  { %v26_v1 = vlaneseq  ;;  %v170_v2 = vmov 1966171168   ;;  %s227_s0 = inlined_call_operand.vmem [shape: f32[8,2,32], index: 0, kind: input, shape index: {}]   ;;  %s228_s1 = inlined_call_operand.vmem [shape: f32[64,32], index: 1, kind: input, shape index: {}]   ;;  %s229_s2 = inlined_call_operand.hbm [shape: f32[8,2,32], index: 2, kind: output, shape index: {}]  }
   0x1   :  { %v20_v0 = vld [vmem:[%s228_s1] sm:$0xff]  ;;  %v24_v3 = vunpack.c.l.s4 %v170_v2 }
   0x2   :  { %v27_v4 = vshrl.u32 %v26_v1, 7  ;;  %v22_v6 = vcombine.high %v20_v0, %v20_v0 }
   0x3   :  { %v25_v5 = vunpack.c.0.s8 %v24_v3 }
   0x4   :  { %7 = vsyncpa [#allocation3], 0  ;;  %v73_v9 = vsub.s32 0, %v27_v4  ;;  %v12_v15 = vld [vmem:[%s227_s0] sm:$0x3]  ;;  %vm119_vm0 = vcmask 254976  }
   0x5   :  { %v28_v7 = vsub.s32 %v25_v5, %v27_v4  ;;  %v16_v19 = vld [vmem:[%s227_s0 + $0x8] sm:$0x3]  ;;  %v13_v21 = vld [vmem:[%s227_s0 + $0x2] sm:$0x3]  ;;  %v14_v22 = vld [vmem:[%s227_s0 + $0x4] sm:$0x3] }
   0x6   :  { %v17_v29 = vld [vmem:[%s227_s0 + $0xa] sm:$0x3]  ;;  %v18_v30 = vld [vmem:[%s227_s0 + $0xc] sm:$0x3]  ;;  %v15_v31 = vld [vmem:[%s227_s0 + $0x6] sm:$0x3] }
   0x7   :  { %v29_v8 = vrot.slane %v20_v0, %v28_v7  ;;  %v36_v10 = vrot.slane %v22_v6, %v28_v7  ;;  %v19_v39 = vld [vmem:[%s227_s0 + $0xe] sm:$0x3]  ;;  %s171_s26 = smov [#allocation2]  }
   0x8   :  { %s133_s27 = sshll.u32 %s171_s26, 4  ;;  %s134_s27 = int_to_ptr.vmem [resolvable:$true] %s133_s27 }
   0x9   :  { %v45_v11 = vrot.slane %v29_v8, %v28_v7  ;;  %v37_v12 = vcombine.high %v29_v8, %v29_v8  ;;  %v52_v13 = vrot.slane %v36_v10, %v28_v7  ;;  %v38_v14 = vcombine.high %v36_v10, %v36_v10  ;;  %s148_s0 = scalar_lea.vmem %s134_s27, 256  ;;  %p153_p1 = scmp.lt.s32.totalorder %s134_s27, %s134_s27 }
   0xa   :  { %p149_p0 = scmp.ne.s32.totalorder %s134_s27, %s148_s0  ;;  %p154_p2 = scmp.lt.s32.totalorder %s148_s0, %s148_s0 }
   0xb   :  { %v74_v16 = vrot.slane %v45_v11, %v73_v9  ;;  %v59_v17 = vrot.slane %v37_v12, %v28_v7  ;;  %v67_v18 = vcombine.high %v45_v11, %v45_v11  ;;  %v90_v20 = vrot.slane %v52_v13, %v73_v9 }
   0xc   :  { %v66_v23 = vrot.slane %v38_v14, %v28_v7  ;;  %v68_v24 = vcombine.high %v52_v13, %v52_v13  ;;  %p155_p3 = por %p154_p2, %p153_p1 }
   0xd   :  { %v111_v25 = vadd.f32 %v74_v16, %v12_v15  ;;  %v78_v26 = vrot.slane %v59_v17, %v73_v9  ;;  %v82_v27 = vrot.slane %v67_v18, %v73_v9  ;;  %v69_v28 = vcombine.high %v59_v17, %v59_v17 }
   0xe   :  { %v115_v32 = vadd.f32 %v90_v20, %v16_v19  ;;  %v94_v33 = vrot.slane %v66_v23, %v73_v9  ;;  %v98_v34 = vrot.slane %v68_v24, %v73_v9  ;;  %v70_v35 = vcombine.high %v66_v23, %v66_v23  ;;  %p156_p4 = pnand %p155_p3, %p149_p0 }
   0xf   :  { %120 = vst.msk [vmem:[#allocation2] sm:$0x3] %vm119_vm0, %v111_v25  ;;  %v112_v36 = vadd.f32 %v78_v26, %v13_v21  ;;  %v113_v37 = vadd.f32 %v82_v27, %v14_v22  ;;  %v86_v38 = vrot.slane %v69_v28, %v73_v9 }
  0x10   :  { %124 = vst.msk [vmem:[#allocation2 + $0x8] sm:$0x3] %vm119_vm0, %v115_v32  ;;  %v116_v40 = vadd.f32 %v94_v33, %v17_v29  ;;  %v117_v41 = vadd.f32 %v98_v34, %v18_v30  ;;  %v102_v42 = vrot.slane %v70_v35, %v73_v9 }
  0x11   :  { %121 = vst.msk [vmem:[#allocation2 + $0x2] sm:$0x3] %vm119_vm0, %v112_v36  ;;  %122 = vst.msk [vmem:[#allocation2 + $0x4] sm:$0x3] %vm119_vm0, %v113_v37  ;;  %v114_v43 = vadd.f32 %v86_v38, %v15_v31 }
  0x12   :  { %125 = vst.msk [vmem:[#allocation2 + $0xa] sm:$0x3] %vm119_vm0, %v116_v40  ;;  %126 = vst.msk [vmem:[#allocation2 + $0xc] sm:$0x3] %vm119_vm0, %v117_v41  ;;  %v118_v44 = vadd.f32 %v102_v42, %v19_v39 }
  0x13   :  { %123 = vst.msk [vmem:[#allocation2 + $0x6] sm:$0x3] %vm119_vm0, %v114_v43 }
  0x14   :  { %127 = vst.msk [vmem:[#allocation2 + $0xe] sm:$0x3] %vm119_vm0, %v118_v44 }
  0x15   :  { %159 = shalt.err (!%p156_p4)
}
  0x16   :  { %s172_s28 = smov 32   ;;  %s173_s29 = smov 2  }
  0x17   :  { %139 = dma.vmem_to_hbm [thread:$0]  %s134_s27, 256, %s229_s2, [#allocation3], %s172_s28, %s172_s28, %s173_s29  }
  0x18   :  { %168 = dma.done.wait [#allocation3], 256  }
  0x19   :  { %169 = vsyncadd [#allocation3], 4294967040 }
  0x1a   :  { %143 = vsyncpa [#allocation3], 1 }

</bundles_post_ra>
